<compile_context>
chip_gen: v6e
topology: v6e:2x2x1
jax: 0.10.0
libtpu: 0.0.40
codegen_flags: <defaults>
</compile_context>

<pallas_src>
import functools

import jax
import jax.numpy as jnp
from jax import lax
from jax.experimental import pallas as pl
from jax.experimental.pallas import tpu as pltpu


def _round_up(x, m):
    return ((x + m - 1) // m) * m


# --------------------------------------------------------------------------------------
# Kernel 1: tiled feature matmul  Z = H @ W   (K-reduction over the input-feature dim)
# --------------------------------------------------------------------------------------
def matmul_kernel(x_ref, w_ref, o_ref, acc_ref):
    @pl.when(pl.program_id(1) == 0)
    def _():
        acc_ref[...] = jnp.zeros_like(acc_ref)

    acc_ref[...] += jnp.dot(x_ref[...], w_ref[...], preferred_element_type=jnp.float32)

    @pl.when(pl.program_id(1) == pl.num_programs(1) - 1)
    def _():
        o_ref[...] = acc_ref[...].astype(o_ref.dtype)


def matmul_xw(x, w, *, tm, tk):
    """x: [N_pad, K_pad] bf16, w: [K_pad, H_pad] bf16 -> [N_pad, H_pad] bf16."""
    n, k_dim = x.shape
    h = w.shape[1]
    grid = (n // tm, k_dim // tk)
    return pl.pallas_call(
        matmul_kernel,
        out_shape=jax.ShapeDtypeStruct((n, h), jnp.bfloat16),
        grid_spec=pltpu.PrefetchScalarGridSpec(
            num_scalar_prefetch=0,
            grid=grid,
            in_specs=[
                pl.BlockSpec((tm, tk), lambda i, k: (i, k)),
                pl.BlockSpec((tk, h), lambda i, k: (k, 0)),
            ],
            out_specs=pl.BlockSpec((tm, h), lambda i, k: (i, 0)),
            scratch_shapes=[pltpu.VMEM((tm, h), jnp.float32)],
        ),
        compiler_params=pltpu.CompilerParams(
            dimension_semantics=("parallel", "arbitrary")),
    )(x, w)


# --------------------------------------------------------------------------------------
# Kernel 2: neighbour aggregation  out = act(A_hat @ Z + b)
#           grid = (row blocks, K blocks over the node dim); bias/activation on last K.
# --------------------------------------------------------------------------------------
def agg_kernel(a_ref, z_ref, b_ref, o_ref, acc_ref, *, activation, valid_cols):
    @pl.when(pl.program_id(1) == 0)
    def _():
        acc_ref[...] = jnp.zeros_like(acc_ref)

    acc_ref[...] += jnp.dot(a_ref[...], z_ref[...], preferred_element_type=jnp.float32)

    @pl.when(pl.program_id(1) == pl.num_programs(1) - 1)
    def _():
        h = acc_ref[...] + b_ref[...]  # bias added exactly once (last K step)
        if activation == "relu":
            o_ref[...] = jnp.maximum(h, 0.0).astype(o_ref.dtype)
        else:
            # softmax(dim=1) followed by log_softmax(dim=1) (faithful to the module),
            # with padded class columns masked out of both reductions.
            cols = lax.broadcasted_iota(jnp.int32, h.shape, dimension=1)
            mask = cols < valid_cols
            neg = -1e30
            hm = jnp.where(mask, h, neg)
            m = jnp.max(hm, axis=1, keepdims=True)
            e = jnp.where(mask, jnp.exp(hm - m), 0.0)
            s = e * pl.reciprocal(jnp.sum(e, axis=1, keepdims=True), approx=True)
            sm = jnp.where(mask, s, neg)
            m2 = jnp.max(sm, axis=1, keepdims=True)
            lse = m2 + jnp.log(
                jnp.sum(jnp.where(mask, jnp.exp(sm - m2), 0.0), axis=1, keepdims=True))
            o_ref[...] = (s - lse).astype(o_ref.dtype)


def aggregate(a, z, b, *, tm, tk, activation, out_dtype, valid_cols=None):
    """a: [N_pad, N_pad] bf16, z: [N_pad, H_pad] bf16, b: [1, H_pad] f32."""
    n = a.shape[0]
    h = z.shape[1]
    grid = (n // tm, n // tk)
    kern = functools.partial(agg_kernel, activation=activation, valid_cols=valid_cols)
    return pl.pallas_call(
        kern,
        out_shape=jax.ShapeDtypeStruct((n, h), out_dtype),
        grid_spec=pltpu.PrefetchScalarGridSpec(
            num_scalar_prefetch=0,
            grid=grid,
            in_specs=[
                pl.BlockSpec((tm, tk), lambda i, k: (i, k)),
                pl.BlockSpec((tk, h), lambda i, k: (k, 0)),
                pl.BlockSpec((1, h), lambda i, k: (0, 0)),
            ],
            out_specs=pl.BlockSpec((tm, h), lambda i, k: (i, 0)),
            scratch_shapes=[pltpu.VMEM((tm, h), jnp.float32)],
        ),
        compiler_params=pltpu.CompilerParams(
            dimension_semantics=("parallel", "arbitrary")),
    )(a, z, b)


# --------------------------------------------------------------------------------------
# Full forward on padded inputs.
# --------------------------------------------------------------------------------------
def gcn3_forward(a_hat, x, params, *, num_classes, tm, tk_feat):
    """a_hat: [N_pad, N_pad] bf16, x: [N_pad, F_pad] bf16, params padded (W bf16, b f32).
    Returns [N_pad, C_pad] f32 log-probabilities; caller slices to [N, C]."""
    w1, b1, w2, b2, w3, b3 = params

    # layer 1: X @ W1 first (feature dim can be large), then aggregate + bias + relu
    xw1 = matmul_xw(x, w1, tm=tm, tk=tk_feat)
    h1 = aggregate(a_hat, xw1, b1, tm=tm, tk=tm,
                   activation="relu", out_dtype=jnp.bfloat16)
    # dropout(training=False) -> identity

    # layer 2
    xw2 = matmul_xw(h1, w2, tm=tm, tk=w2.shape[0])
    h2 = aggregate(a_hat, xw2, b2, tm=tm, tk=tm,
                   activation="relu", out_dtype=jnp.bfloat16)
    # dropout(training=False) -> identity

    # layer 3 + softmax + log_softmax (masked over real class columns)
    xw3 = matmul_xw(h2, w3, tm=tm, tk=w3.shape[0])
    out = aggregate(a_hat, xw3, b3, tm=tm, tk=tm,
                    activation="softmax_log_softmax",
                    out_dtype=jnp.float32, valid_cols=num_classes)
    return out


# --------------------------------------------------------------------------------------
# Plain-JAX glue: graph normalization, params, padding, reference.
# --------------------------------------------------------------------------------------
def build_normalized_adjacency(edge_index, num_nodes):
    src, dst = edge_index
    a = jnp.zeros((num_nodes, num_nodes), jnp.float32)
    a = a.at[src, dst].set(1.0)
    a = a.at[dst, src].set(1.0)                      # symmetric edges
    a = a + jnp.eye(num_nodes, dtype=jnp.float32)    # self loops
    deg = jnp.sum(a, axis=1)
    d_inv_sqrt = jnp.where(deg > 0, 1.0 / jnp.sqrt(deg), 0.0)
    return a * d_inv_sqrt[:, None] * d_inv_sqrt[None, :]


def init_params(key, num_features, hidden, num_classes):
    dims = [(num_features, hidden[0]), (hidden[0], hidden[1]), (hidden[1], num_classes)]
    params = []
    keys = jax.random.split(key, len(dims))
    for k, (fi, fo) in zip(keys, dims):
        scale = jnp.sqrt(6.0 / (fi + fo))
        w = jax.random.uniform(k, (fi, fo), jnp.float32, -scale, scale)
        b = jnp.zeros((1, fo), jnp.float32)
        params += [w, b]
    return tuple(params)


def _pad2(x, rows, cols):
    return jnp.pad(x, ((0, rows - x.shape[0]), (0, cols - x.shape[1])))


def gcn3_reference(a_hat, x, params):
    w1, b1, w2, b2, w3, b3 = params
    h = jnp.maximum(a_hat @ (x @ w1) + b1, 0.0)
    h = jnp.maximum(a_hat @ (h @ w2) + b2, 0.0)
    h = a_hat @ (h @ w3) + b3
    s = jax.nn.softmax(h, axis=1)
    return jax.nn.log_softmax(s, axis=1)


if __name__ == "__main__":
    key = jax.random.PRNGKey(0)
    k_x, k_e, k_p = jax.random.split(key, 3)

    num_nodes = 16          # small synthetic graph (stand-in for Citeseer)
    num_features = 8        # g.num_node_features
    hidden = (16, 16)       # hidden_feature
    num_classes = 8         # g.num_classes
    num_edges = 32

    x = jax.random.normal(k_x, (num_nodes, num_features), jnp.float32)
    edge_index = jax.random.randint(k_e, (2, num_edges), 0, num_nodes)
    a_hat = build_normalized_adjacency(edge_index, num_nodes)
    params = init_params(k_p, num_features, hidden, num_classes)

    # --- tile sizes + padding to lane/sublane friendly shapes -------------------------
    tm = min(512, _round_up(num_nodes, 128))          # node row/col tile
    tk_feat = min(512, _round_up(num_features, 128))  # feature K tile (layer 1)
    n_pad = _round_up(num_nodes, tm)
    f_pad = _round_up(num_features, tk_feat)
    h1_pad = _round_up(hidden[0], 128)
    h2_pad = _round_up(hidden[1], 128)
    c_pad = _round_up(num_classes, 128)

    w1, b1, w2, b2, w3, b3 = params
    a_p = _pad2(a_hat, n_pad, n_pad).astype(jnp.bfloat16)
    x_p = _pad2(x, n_pad, f_pad).astype(jnp.bfloat16)
    params_p = (
        _pad2(w1, f_pad, h1_pad).astype(jnp.bfloat16), _pad2(b1, 1, h1_pad),
        _pad2(w2, h1_pad, h2_pad).astype(jnp.bfloat16), _pad2(b2, 1, h2_pad),
        _pad2(w3, h2_pad, c_pad).astype(jnp.bfloat16), _pad2(b3, 1, c_pad),
    )

    out_p = gcn3_forward(a_p, x_p, params_p, num_classes=num_classes,
                         tm=tm, tk_feat=tk_feat)
    out = out_p[:num_nodes, :num_classes]
    jax.block_until_ready(out)

    ref = gcn3_reference(a_hat, x, params)
    assert out.shape == (num_nodes, num_classes)
    assert bool(jnp.all(jnp.isfinite(out)))
    # bf16 MXU inputs with f32 accumulation -> loosened tolerance vs f32 reference
    assert bool(jnp.allclose(out, ref, atol=7e-2, rtol=0.0)), \
        float(jnp.max(jnp.abs(out - ref)))
    print("KERNEL_OK")
</pallas_src>

<mosaic_0001>
module attributes {stable_mosaic.version = 11 : i64} {
  func.func @matmul_kernel(%arg0: i32, %arg1: i32, %arg2: memref<128x128xbf16, #tpu.memory_space<vmem>>, %arg3: memref<128x128xbf16, #tpu.memory_space<vmem>>, %arg4: memref<128x128xbf16, #tpu.memory_space<vmem>>, %arg5: memref<128x128xf32, #tpu.memory_space<vmem>>) attributes {dimension_semantics = [#tpu.dimension_semantics<parallel>, #tpu.dimension_semantics<arbitrary>], iteration_bounds = array<i64: 1, 1>, scalar_prefetch = 0 : i64, scratch_operands = 1 : i64, tpu.core_type = #tpu.core_type<tc>, window_params = [{transform_indices = @transform_0, window_bounds = array<i64: 128, 128>}, {transform_indices = @transform_1, window_bounds = array<i64: 128, 128>}, {transform_indices = @transform_2, window_bounds = array<i64: 128, 128>}]} {
    %c0_i32 = arith.constant 0 : i32
    %0 = arith.cmpi eq, %arg1, %c0_i32 : i32
    %1 = arith.extui %0 : i1 to i32
    %c0_i32_0 = arith.constant 0 : i32
    %2 = arith.cmpi ne, %1, %c0_i32_0 : i32
    scf.if %2 {
      %cst_10 = arith.constant 0.000000e+00 : f32
      %12 = vector.broadcast %cst_10 : f32 to vector<128x128xf32>
      %c0_11 = arith.constant 0 : index
      %c0_12 = arith.constant 0 : index
      %13 = vector.load %arg5[%c0_11, %c0_12] : memref<128x128xf32, #tpu.memory_space<vmem>>, vector<128x128xf32>
      tpu.vector_store %arg5[%c0_11, %c0_12], %12 {strides = array<i32>} : memref<128x128xf32, #tpu.memory_space<vmem>>, vector<128x128xf32>,
    } else {
    }
    %c0 = arith.constant 0 : index
    %c0_1 = arith.constant 0 : index
    %3 = vector.load %arg5[%c0, %c0_1] : memref<128x128xf32, #tpu.memory_space<vmem>>, vector<128x128xf32>
    %c0_2 = arith.constant 0 : index
    %c0_3 = arith.constant 0 : index
    %4 = vector.load %arg2[%c0_2, %c0_3] : memref<128x128xbf16, #tpu.memory_space<vmem>>, vector<128x128xbf16>
    %c0_4 = arith.constant 0 : index
    %c0_5 = arith.constant 0 : index
    %5 = vector.load %arg3[%c0_4, %c0_5] : memref<128x128xbf16, #tpu.memory_space<vmem>>, vector<128x128xbf16>
    %cst = arith.constant dense<0.000000e+00> : vector<128x128xf32>
    %6 = tpu.matmul %4, %5, %cst {dimension_numbers = #tpu.dot_dimension_numbers<[1], [0], [0], [1], [0, 0, 1, 1], [], []>} : vector<128x128xbf16>, vector<128x128xbf16>, vector<128x128xf32> -> vector<128x128xf32>
    %7 = arith.addf %3, %6 : vector<128x128xf32>
    %c0_6 = arith.constant 0 : index
    %c0_7 = arith.constant 0 : index
    %8 = vector.load %arg5[%c0_6, %c0_7] : memref<128x128xf32, #tpu.memory_space<vmem>>, vector<128x128xf32>
    tpu.vector_store %arg5[%c0_6, %c0_7], %7 {strides = array<i32>} : memref<128x128xf32, #tpu.memory_space<vmem>>, vector<128x128xf32>,
    %c0_i32_8 = arith.constant 0 : i32
    %9 = arith.cmpi eq, %arg1, %c0_i32_8 : i32
    %10 = arith.extui %9 : i1 to i32
    %c0_i32_9 = arith.constant 0 : i32
    %11 = arith.cmpi ne, %10, %c0_i32_9 : i32
    scf.if %11 {
      %c0_10 = arith.constant 0 : index
      %c0_11 = arith.constant 0 : index
      %12 = vector.load %arg5[%c0_10, %c0_11] : memref<128x128xf32, #tpu.memory_space<vmem>>, vector<128x128xf32>
      %13 = arith.truncf %12 : vector<128x128xf32> to vector<128x128xbf16>
      %c0_12 = arith.constant 0 : index
      %c0_13 = arith.constant 0 : index
      %14 = vector.load %arg4[%c0_12, %c0_13] : memref<128x128xbf16, #tpu.memory_space<vmem>>, vector<128x128xbf16>
      tpu.vector_store %arg4[%c0_12, %c0_13], %13 {strides = array<i32>} : memref<128x128xbf16, #tpu.memory_space<vmem>>, vector<128x128xbf16>,
    } else {
    }
    return
  }
  func.func @transform_0(%arg0: i32, %arg1: i32) -> (i32, i32) {
    %c0_i32 = arith.constant 0 : i32
    return %arg0, %arg1 : i32, i32
  }
  func.func @transform_1(%arg0: i32, %arg1: i32) -> (i32, i32) {
    %c0_i32 = arith.constant 0 : i32
    %c0_i32_0 = arith.constant 0 : i32
    return %arg1, %c0_i32 : i32, i32
  }
  func.func @transform_2(%arg0: i32, %arg1: i32) -> (i32, i32) {
    %c0_i32 = arith.constant 0 : i32
    %c0_i32_0 = arith.constant 0 : i32
    return %arg0, %c0_i32 : i32, i32
  }
}

</mosaic_0001>

<bundles_post_ra>
// kernel: tpu_custom_call.1
= control target key start
LH: loop header
LB: loop body
LE: loop exit
PB: predicated region body
PF: predicated region fallthrough
CT: control target
= control target key end

     0   :  { %7 = vsyncpa [#allocation4], 0  ;;  %s735_s0 = inlined_call_operand.hbm [shape: bf16[128,128], index: 0, kind: input, shape index: {}]   ;;  %s736_s1 = inlined_call_operand.hbm [shape: bf16[128,128], index: 1, kind: input, shape index: {}]   ;;  %s737_s2 = inlined_call_operand.hbm [shape: bf16[128,128], index: 2, kind: output, shape index: {}]  }
   0x1   :  { %8 = vsyncpa [#allocation7], 0 }
   0x2   :  { %9 = vsyncpa [#allocation5], 0  ;;  %s697_s9 = smov [#allocation3]  }
   0x3   :  { %s15_s10 = sshll.u32 %s697_s9, 4  ;;  %s16_s10 = int_to_ptr.vmem [resolvable:$true] %s15_s10 }
   0x4   :  { %s639_s11 = scalar_lea.vmem %s16_s10, 1024  ;;  %p644_p1 = scmp.lt.s32.totalorder %s16_s10, %s16_s10 }
   0x5   :  { %p640_p0 = scmp.ne.s32.totalorder %s16_s10, %s639_s11  ;;  %p645_p2 = scmp.lt.s32.totalorder %s639_s11, %s639_s11 }
   0x7   :  { %p646_p3 = por %p645_p2, %p644_p1 }
   0x9   :  { %p647_p4 = pnand %p646_p3, %p640_p0 }
   0xb   :  { %650 = shalt.err (!%p647_p4)
}
   0xc   :  { %s698_s12 = smov 64   ;;  %s699_s13 = smov 4  }
   0xd   :  { %21 = dma.hbm_to_vmem [thread:$0]  %s735_s0, 1024, %s16_s10, [#allocation4], %s698_s12, %s698_s12, %s699_s13  }
   0xe   :  { %s700_s16 = smov [#allocation6]  }
   0xf   :  { %s27_s17 = sshll.u32 %s700_s16, 4  ;;  %s28_s17 = int_to_ptr.vmem [resolvable:$true] %s27_s17 }
  0x10   :  { %s659_s18 = scalar_lea.vmem %s28_s17, 1024  ;;  %p664_p6 = scmp.lt.s32.totalorder %s28_s17, %s28_s17 }
  0x11   :  { %p660_p5 = scmp.ne.s32.totalorder %s28_s17, %s659_s18  ;;  %p665_p7 = scmp.lt.s32.totalorder %s659_s18, %s659_s18 }
  0x13   :  { %p666_p8 = por %p665_p7, %p664_p6 }
  0x15   :  { %p667_p9 = pnand %p666_p8, %p660_p5 }
  0x17   :  { %670 = shalt.err (!%p667_p9)
}
  0x18   :  { %33 = dma.hbm_to_vmem [thread:$0]  %s736_s1, 1024, %s28_s17, [#allocation7], %s698_s12, %s698_s12, %s699_s13  }
  0x19   :  { %691 = dma.done.wait [#allocation4], 1024  }
  0x1a   :  { %692 = vsyncadd [#allocation4], 4294966272 }
  0x1b   :  { %693 = dma.done.wait [#allocation7], 1024  }
  0x1c   :  { %694 = vsyncadd [#allocation7], 4294966272  ;;  %v615_v0 = vld [vmem:[#allocation6 + $0x38] sm:$0xff]   ;;  %v616_v1 = vld [vmem:[#allocation6 + $0x30] sm:$0xff]   ;;  %s701_s0 = smov [#allocation8]  }
  0x1d   :  { %562 = vmatprep.subr.bf16.mxu0 %v615_v0  ;;  %594 = vmatprep.subr.bf16.mxu1 %v615_v0  ;;  %v617_v2 = vld [vmem:[#allocation6 + $0x28] sm:$0xff]   ;;  %v618_v3 = vld [vmem:[#allocation6 + $0x20] sm:$0xff]   ;;  %v619_v6 = vld [vmem:[#allocation6 + $0x18] sm:$0xff]   ;;  %s438_s1 = sshll.u32 %s701_s0, 4  ;;  %s439_s1 = int_to_ptr.vmem [resolvable:$true] %s438_s1 }
  0x1e   :  { %563 = vmatpush3.bf16.msra.mxu0 %v615_v0  ;;  %602 = vmatpush3.bf16.msra.mxu1 %v615_v0  ;;  %v623_v4 = vld [vmem:[#allocation3] sm:$0xff]   ;;  %v620_v7 = vld [vmem:[#allocation6 + $0x10] sm:$0xff]   ;;  %v621_v8 = vld [vmem:[#allocation6 + $0x8] sm:$0xff]   ;;  %s671_s21 = scalar_lea.vmem %s439_s1, 1024  ;;  %p676_p11 = scmp.lt.s32.totalorder %s439_s1, %s439_s1 }
  0x1f   :  { %564 = vmatprep.subr.bf16.mxu0 %v616_v1  ;;  %595 = vmatprep.subr.bf16.mxu1 %v616_v1  ;;  %v624_v5 = vld [vmem:[#allocation3 + $0x20] sm:$0xff]   ;;  %v625_v10 = vld [vmem:[#allocation3 + $0x8] sm:$0xff]   ;;  %v627_v12 = vld [vmem:[#allocation3 + $0x10] sm:$0xff]   ;;  %p672_p10 = scmp.ne.s32.totalorder %s439_s1, %s671_s21  ;;  %p677_p12 = scmp.lt.s32.totalorder %s671_s21, %s671_s21 }
  0x20   :  { %578 = vmatprep.mubr.bf16.mxu0 %v623_v4  ;;  %586 = vmatprep.mubr.bf16.mxu1 %v624_v5  ;;  %v622_v9 = vld [vmem:[#allocation6] sm:$0xff]   ;;  %v626_v11 = vld [vmem:[#allocation3 + $0x28] sm:$0xff]   ;;  %v628_v13 = vld [vmem:[#allocation3 + $0x30] sm:$0xff]  }
  0x21   :  { %v629_v14 = vld [vmem:[#allocation3 + $0x18] sm:$0xff]   ;;  %p678_p13 = por %p677_p12, %p676_p11 }
  0x22   :  { %565 = vmatpush3.bf16.msra.mxu0 %v616_v1  ;;  %603 = vmatpush3.bf16.msra.mxu1 %v616_v1  ;;  %v630_v15 = vld [vmem:[#allocation3 + $0x38] sm:$0xff]  }
  0x23   :  { %566 = vmatprep.subr.bf16.mxu0 %v617_v2  ;;  %596 = vmatprep.subr.bf16.mxu1 %v617_v2  ;;  %p679_p0 = pnand %p678_p13, %p672_p10 }
  0x26   :  { %567 = vmatpush3.bf16.msra.mxu0 %v617_v2  ;;  %604 = vmatpush3.bf16.msra.mxu1 %v617_v2 }
  0x27   :  { %568 = vmatprep.subr.bf16.mxu0 %v618_v3  ;;  %597 = vmatprep.subr.bf16.mxu1 %v618_v3 }
  0x2a   :  { %569 = vmatpush3.bf16.msra.mxu0 %v618_v3  ;;  %605 = vmatpush3.bf16.msra.mxu1 %v618_v3 }
  0x2b   :  { %570 = vmatprep.subr.bf16.mxu0 %v619_v6  ;;  %598 = vmatprep.subr.bf16.mxu1 %v619_v6 }
  0x2e   :  { %571 = vmatpush3.bf16.msra.mxu0 %v619_v6  ;;  %606 = vmatpush3.bf16.msra.mxu1 %v619_v6 }
  0x2f   :  { %572 = vmatprep.subr.bf16.mxu0 %v620_v7  ;;  %599 = vmatprep.subr.bf16.mxu1 %v620_v7 }
  0x32   :  { %573 = vmatpush3.bf16.msra.mxu0 %v620_v7  ;;  %607 = vmatpush3.bf16.msra.mxu1 %v620_v7 }
  0x33   :  { %574 = vmatprep.subr.bf16.mxu0 %v621_v8  ;;  %600 = vmatprep.subr.bf16.mxu1 %v621_v8 }
  0x36   :  { %575 = vmatpush3.bf16.msra.mxu0 %v621_v8  ;;  %608 = vmatpush3.bf16.msra.mxu1 %v621_v8 }
  0x37   :  { %576 = vmatprep.subr.bf16.mxu0 %v622_v9  ;;  %601 = vmatprep.subr.bf16.mxu1 %v622_v9 }
  0x3a   :  { %577 = vmatpush3.bf16.msra.mxu0 %v622_v9  ;;  %609 = vmatpush3.bf16.msra.mxu1 %v622_v9 }
  0x3d   :  { %579 = vmatmul.mubr.bf16.vlgmr.msra.gmra.mxu0 %v625_v10  ;;  %587 = vmatmul.mubr.bf16.vlgmr.msra.gmra.mxu1 %v626_v11 }
  0x3e   :  { %582 = vmatprep.mubr.bf16.mxu0 %v627_v12  ;;  %590 = vmatprep.mubr.bf16.mxu1 %v628_v13 }
  0x45   :  { %583 = vmatmul.mubr.bf16.gmra.mxu0 %v629_v14  ;;  %591 = vmatmul.mubr.bf16.gmra.mxu1 %v630_v15 }
  0xfd   :  { %v580_v16 = vpop.f32.mrf.mxu0  ;;  %v588_v17 = vpop.f32.mrf.mxu1 }
  0xff   :  { %v239_v18 = vpop.f32.mrf.mxu0  ;;  %v271_v19 = vpop.f32.mrf.mxu1 }
 0x101   :  { %v581_v20 = vpop.f32.mrf.mxu0  ;;  %v589_v21 = vpop.f32.mrf.mxu1 }
 0x102   :  { %v507_v22 = vpack.c.bf16 %v581_v20, %v580_v16  ;;  %v527_v23 = vpack.c.bf16 %v589_v21, %v588_v17 }
 0x103   :  { %v242_v24 = vpop.f32.mrf.mxu0  ;;  %v274_v25 = vpop.f32.mrf.mxu1 }
 0x104   :  { %539 = vst [vmem:[#allocation8 + $0x8] sm:$0xff] %v507_v22   ;;  %543 = vst [vmem:[#allocation8 + $0x28] sm:$0xff] %v527_v23   ;;  %v502_v26 = vpack.c.bf16 %v242_v24, %v239_v18  ;;  %v522_v27 = vpack.c.bf16 %v274_v25, %v271_v19 }
 0x105   :  { %v584_v28 = vpop.f32.mrf.mxu0  ;;  %v592_v29 = vpop.f32.mrf.mxu1 }
 0x106   :  { %503 = vst [vmem:[#allocation8] sm:$0xff] %v502_v26   ;;  %542 = vst [vmem:[#allocation8 + $0x20] sm:$0xff] %v522_v27  }
 0x107   :  { %v255_v30 = vpop.f32.mrf.mxu0  ;;  %v287_v31 = vpop.f32.mrf.mxu1 }
 0x109   :  { %v585_v32 = vpop.f32.mrf.mxu0  ;;  %v593_v33 = vpop.f32.mrf.mxu1 }
 0x10a   :  { %v517_v34 = vpack.c.bf16 %v585_v32, %v584_v28  ;;  %v537_v35 = vpack.c.bf16 %v593_v33, %v592_v29 }
 0x10b   :  { %v258_v36 = vpop.f32.mrf.mxu0  ;;  %v290_v37 = vpop.f32.mrf.mxu1 }
 0x10c   :  { %541 = vst [vmem:[#allocation8 + $0x18] sm:$0xff] %v517_v34   ;;  %545 = vst [vmem:[#allocation8 + $0x38] sm:$0xff] %v537_v35   ;;  %v512_v38 = vpack.c.bf16 %v258_v36, %v255_v30  ;;  %v532_v39 = vpack.c.bf16 %v290_v37, %v287_v31 }
 0x10e   :  { %540 = vst [vmem:[#allocation8 + $0x10] sm:$0xff] %v512_v38   ;;  %544 = vst [vmem:[#allocation8 + $0x30] sm:$0xff] %v532_v39  }
 0x10f   :  { %682 = shalt.err (!%p679_p0)
}
 0x110   :  { %444 = dma.vmem_to_hbm [thread:$0]  %s439_s1, 1024, %s737_s2, [#allocation5], %s698_s12, %s698_s12, %s699_s13  }
 0x111   :  { %695 = dma.done.wait [#allocation5], 1024  }
 0x112   :  { %696 = vsyncadd [#allocation5], 4294966272 }
 0x113   :  { %448 = vsyncpa [#allocation4], 1 }
 0x114   :  { %449 = vsyncpa [#allocation7], 1 }
 0x115   :  { %450 = vsyncpa [#allocation5], 1 }

</bundles_post_ra>
